<compile_context>
chip_gen: v5e
topology: v5e:2x2
jax: 0.10.0
libtpu: 0.0.40
codegen_flags: <defaults>
</compile_context>

<pallas_src>
import functools

import jax
import jax.numpy as jnp
from jax import lax
from jax.experimental import pallas as pl
from jax.experimental.pallas import tpu as pltpu


def _round_up(x: int, m: int) -> int:
    return ((x + m - 1) // m) * m


def _mlp_kernel(x_ref, w1_ref, b1_ref, w2_ref, b2_ref, o_ref, *, compute_dtype):
    x = x_ref[...]
    w1 = w1_ref[...]          # [hidden, in_dim]   (PyTorch layout, resident)
    w2 = w2_ref[...]          # [out_pad, hidden]  (PyTorch layout, resident)
    if compute_dtype is not None:
        x = x.astype(compute_dtype)
        w1 = w1.astype(compute_dtype)
        w2 = w2.astype(compute_dtype)

    # fc1: contract in_dim of x (dim 1) with in_dim of W1 (dim 1) -> [TM, hidden].
    h = lax.dot_general(x, w1, dimension_numbers=(((1,), (1,)), ((), ())),
                        preferred_element_type=jnp.float32)
    # Bias-add + ReLU in f32 (read bias once; [1, hidden] broadcasts over rows).
    h = jnp.maximum(h + b1_ref[...], 0.0)
    if compute_dtype is not None:
        h = h.astype(compute_dtype)

    # fc2: contract hidden of h (dim 1) with hidden of W2 (dim 1) -> [TM, out_pad].
    y = lax.dot_general(h, w2, dimension_numbers=(((1,), (1,)), ((), ())),
                        preferred_element_type=jnp.float32)
    o_ref[...] = (y + b2_ref[...]).astype(o_ref.dtype)


def simple_mlp(x, w1, b1, w2, b2, *, compute_dtype=None, tm_max=512):
    """Fused MLP forward.

    x: [B, in_dim]; w1: [hidden, in_dim]; b1: [hidden];
    w2: [out_dim, hidden]; b2: [out_dim]   (PyTorch nn.Linear conventions).
    compute_dtype: optional MXU operand dtype (e.g. jnp.bfloat16); accumulation
    and the bias/ReLU epilogue remain f32 regardless.
    """
    B, in_dim = x.shape
    hidden = w1.shape[0]
    out_dim = w2.shape[0]

    # --- Batch tile: largest multiple of 8 (sublane) up to tm_max that covers B.
    TM = min(tm_max, _round_up(B, 8))
    B_pad = _round_up(B, TM)

    # --- Lane-dense output: pad out_dim to a multiple of 128 with zero weight
    #     rows / zero bias; padded columns are sliced off after the call.
    out_pad = _round_up(out_dim, 128)

    x_p = x if B_pad == B else jnp.pad(x, ((0, B_pad - B), (0, 0)))
    w2_p = w2 if out_pad == out_dim else jnp.pad(w2, ((0, out_pad - out_dim), (0, 0)))
    b2_p = b2 if out_pad == out_dim else jnp.pad(b2, (0, out_pad - out_dim))
    b1_2d = b1.reshape(1, hidden)
    b2_2d = b2_p.reshape(1, out_pad)

    grid = (B_pad // TM,)

    flops = 2 * B * in_dim * hidden + 2 * B * hidden * out_dim
    itemsize = jnp.dtype(x.dtype).itemsize
    bytes_accessed = itemsize * (
        B * in_dim + hidden * in_dim + hidden
        + out_dim * hidden + out_dim + B * out_dim)
    cost = pl.CostEstimate(flops=flops, transcendentals=0,
                           bytes_accessed=bytes_accessed)

    kernel = functools.partial(_mlp_kernel, compute_dtype=compute_dtype)

    out_p = pl.pallas_call(
        kernel,
        out_shape=jax.ShapeDtypeStruct((B_pad, out_pad), x.dtype),
        grid_spec=pltpu.PrefetchScalarGridSpec(
            num_scalar_prefetch=0,
            grid=grid,
            in_specs=[
                # Streaming operand: one batch tile per grid step (pipelined).
                pl.BlockSpec((TM, in_dim), lambda i: (i, 0)),
                # Weights / biases: constant index_map -> VMEM-resident.
                pl.BlockSpec((hidden, in_dim), lambda i: (0, 0)),
                pl.BlockSpec((1, hidden), lambda i: (0, 0)),
                pl.BlockSpec((out_pad, hidden), lambda i: (0, 0)),
                pl.BlockSpec((1, out_pad), lambda i: (0, 0)),
            ],
            out_specs=pl.BlockSpec((TM, out_pad), lambda i: (i, 0)),
        ),
        compiler_params=pltpu.CompilerParams(
            dimension_semantics=("parallel",)),
        cost_estimate=cost,
    )(x_p, w1, b1_2d, w2_p, b2_2d)

    return out_p[:B, :out_dim]


if __name__ == "__main__":
    in_dim, hidden, out_dim = 4, 8, 2
    batch = 2

    key = jax.random.PRNGKey(0)
    kx, k1, kb1, k2, kb2 = jax.random.split(key, 5)

    # Deterministic synthetic parameters (PyTorch nn.Linear shapes).
    x = jax.random.normal(kx, (batch, in_dim), dtype=jnp.float32)
    w1 = jax.random.normal(k1, (hidden, in_dim), dtype=jnp.float32) * 0.5
    b1 = jax.random.normal(kb1, (hidden,), dtype=jnp.float32) * 0.1
    w2 = jax.random.normal(k2, (out_dim, hidden), dtype=jnp.float32) * 0.5
    b2 = jax.random.normal(kb2, (out_dim,), dtype=jnp.float32) * 0.1

    out = simple_mlp(x, w1, b1, w2, b2)
    jax.block_until_ready(out)

    # Pure-JAX reference check of the same forward semantics.
    ref = jnp.maximum(x @ w1.T + b1, 0.0) @ w2.T + b2
    assert out.shape == (batch, out_dim)
    assert jnp.allclose(out, ref, atol=1e-5, rtol=1e-5), "mismatch vs reference"

    print("KERNEL_OK")
</pallas_src>

<mosaic_0001>
module attributes {stable_mosaic.version = 11 : i64} {
  func.func @_mlp_kernel(%arg0: i32, %arg1: memref<8x4xf32, #tpu.memory_space<vmem>>, %arg2: memref<8x4xf32, #tpu.memory_space<vmem>>, %arg3: memref<1x8xf32, #tpu.memory_space<vmem>>, %arg4: memref<128x8xf32, #tpu.memory_space<vmem>>, %arg5: memref<1x128xf32, #tpu.memory_space<vmem>>, %arg6: memref<8x128xf32, #tpu.memory_space<vmem>>) attributes {dimension_semantics = [#tpu.dimension_semantics<parallel>], iteration_bounds = array<i64: 1>, scalar_prefetch = 0 : i64, scratch_operands = 0 : i64, tpu.core_type = #tpu.core_type<tc>, window_params = [{transform_indices = @transform_0, window_bounds = array<i64: 8, 4>}, {pipeline_mode = #tpu.pipeline_mode<synchronous>, transform_indices = @transform_1, window_bounds = array<i64: 8, 4>}, {pipeline_mode = #tpu.pipeline_mode<synchronous>, transform_indices = @transform_2, window_bounds = array<i64: 1, 8>}, {pipeline_mode = #tpu.pipeline_mode<synchronous>, transform_indices = @transform_3, window_bounds = array<i64: 128, 8>}, {pipeline_mode = #tpu.pipeline_mode<synchronous>, transform_indices = @transform_4, window_bounds = array<i64: 1, 128>}, {transform_indices = @transform_5, window_bounds = array<i64: 8, 128>}]} {
    %c0 = arith.constant 0 : index
    %c0_0 = arith.constant 0 : index
    %0 = vector.load %arg1[%c0, %c0_0] : memref<8x4xf32, #tpu.memory_space<vmem>>, vector<8x4xf32>
    %c0_1 = arith.constant 0 : index
    %c0_2 = arith.constant 0 : index
    %1 = vector.load %arg2[%c0_1, %c0_2] : memref<8x4xf32, #tpu.memory_space<vmem>>, vector<8x4xf32>
    %c0_3 = arith.constant 0 : index
    %c0_4 = arith.constant 0 : index
    %2 = vector.load %arg4[%c0_3, %c0_4] : memref<128x8xf32, #tpu.memory_space<vmem>>, vector<128x8xf32>
    %cst = arith.constant dense<0.000000e+00> : vector<8x8xf32>
    %3 = tpu.matmul %0, %1, %cst {dimension_numbers = #tpu.dot_dimension_numbers<[1], [1], [0], [0], [0, 0, 1, 0], [], []>} : vector<8x4xf32>, vector<8x4xf32>, vector<8x8xf32> -> vector<8x8xf32>
    %c0_5 = arith.constant 0 : index
    %c0_6 = arith.constant 0 : index
    %4 = vector.load %arg3[%c0_5, %c0_6] : memref<1x8xf32, #tpu.memory_space<vmem>>, vector<1x8xf32>
    %5 = vector.broadcast %4 : vector<1x8xf32> to vector<8x8xf32>
    %6 = arith.addf %3, %5 : vector<8x8xf32>
    %cst_7 = arith.constant 0.000000e+00 : f32
    %7 = vector.broadcast %cst_7 : f32 to vector<8x8xf32>
    %8 = arith.maximumf %6, %7 : vector<8x8xf32>
    %cst_8 = arith.constant dense<0.000000e+00> : vector<8x128xf32>
    %9 = tpu.matmul %8, %2, %cst_8 {dimension_numbers = #tpu.dot_dimension_numbers<[1], [1], [0], [0], [0, 0, 1, 0], [], []>} : vector<8x8xf32>, vector<128x8xf32>, vector<8x128xf32> -> vector<8x128xf32>
    %c0_9 = arith.constant 0 : index
    %c0_10 = arith.constant 0 : index
    %10 = vector.load %arg5[%c0_9, %c0_10] : memref<1x128xf32, #tpu.memory_space<vmem>>, vector<1x128xf32>
    %11 = vector.broadcast %10 : vector<1x128xf32> to vector<8x128xf32>
    %12 = arith.addf %9, %11 : vector<8x128xf32>
    %c0_11 = arith.constant 0 : index
    %c0_12 = arith.constant 0 : index
    %13 = vector.load %arg6[%c0_11, %c0_12] : memref<8x128xf32, #tpu.memory_space<vmem>>, vector<8x128xf32>
    tpu.vector_store %arg6[%c0_11, %c0_12], %12 {strides = array<i32>} : memref<8x128xf32, #tpu.memory_space<vmem>>, vector<8x128xf32>,
    return
  }
  func.func @transform_0(%arg0: i32) -> (i32, i32) {
    %c0_i32 = arith.constant 0 : i32
    %c0_i32_0 = arith.constant 0 : i32
    return %arg0, %c0_i32 : i32, i32
  }
  func.func @transform_1(%arg0: i32) -> (i32, i32) {
    %c0_i32 = arith.constant 0 : i32
    %c0_i32_0 = arith.constant 0 : i32
    %c0_i32_1 = arith.constant 0 : i32
    return %c0_i32, %c0_i32_0 : i32, i32
  }
  func.func @transform_2(%arg0: i32) -> (i32, i32) {
    %c0_i32 = arith.constant 0 : i32
    %c0_i32_0 = arith.constant 0 : i32
    %c0_i32_1 = arith.constant 0 : i32
    return %c0_i32, %c0_i32_0 : i32, i32
  }
  func.func @transform_3(%arg0: i32) -> (i32, i32) {
    %c0_i32 = arith.constant 0 : i32
    %c0_i32_0 = arith.constant 0 : i32
    %c0_i32_1 = arith.constant 0 : i32
    return %c0_i32, %c0_i32_0 : i32, i32
  }
  func.func @transform_4(%arg0: i32) -> (i32, i32) {
    %c0_i32 = arith.constant 0 : i32
    %c0_i32_0 = arith.constant 0 : i32
    %c0_i32_1 = arith.constant 0 : i32
    return %c0_i32, %c0_i32_0 : i32, i32
  }
  func.func @transform_5(%arg0: i32) -> (i32, i32) {
    %c0_i32 = arith.constant 0 : i32
    %c0_i32_0 = arith.constant 0 : i32
    return %arg0, %c0_i32 : i32, i32
  }
}

</mosaic_0001>

<bundles_post_ra>
// kernel: tpu_custom_call.1
= control target key start
LH: loop header
LB: loop body
LE: loop exit
PB: predicated region body
PF: predicated region fallthrough
CT: control target
= control target key end

     0   :  { %vm43_vm0 = vcmask 31744   ;;  %vm75_vm1 = vcmask 64512   ;;  %s323_s0 = inlined_call_operand.vmem [shape: f32[8,4], index: 0, kind: input, shape index: {}]   ;;  %s324_s1 = inlined_call_operand.vmem [shape: f32[8,4], index: 1, kind: input, shape index: {}]   ;;  %s325_s2 = inlined_call_operand.vmem [shape: f32[1,8], index: 2, kind: input, shape index: {}]   ;;  %s326_s3 = inlined_call_operand.vmem [shape: f32[128,8], index: 3, kind: input, shape index: {}]   ;;  %s327_s4 = inlined_call_operand.vmem [shape: f32[1,128], index: 4, kind: input, shape index: {}]   ;;  %s328_s5 = inlined_call_operand.hbm [shape: f32[8,128], index: 5, kind: output, shape index: {}]  }
   0x1   :  { %v22_v0 = vld [vmem:[%s324_s1] sm:$0xff]  ;;  %v38_v1 = vld [vmem:[%s326_s3 + $0x78] sm:$0xff]  ;;  %v37_v3 = vld [vmem:[%s326_s3 + $0x70] sm:$0xff] }
   0x2   :  { %164 = vmatpush.xpose.msk.msra.mxu0 %vm43_vm0, %v22_v0  ;;  %v21_v2 = vld [vmem:[%s323_s0] sm:$0xff]  ;;  %166 = vmatpush.xpose.msk.msra.mxu1 %vm75_vm1, %v38_v1 }
   0x5   :  { %165 = vmatmul.msk.f32.vlgmr.msra.gmra.mxu0 %vm43_vm0, %v21_v2 }
   0x6   :  { %10 = vsyncpa [#allocation3], 0  ;;  %167 = vmatpush.xpose.msk.msra.mxu1 %vm75_vm1, %v37_v3  ;;  %v36_v4 = vld [vmem:[%s326_s3 + $0x68] sm:$0xff]  ;;  %v35_v5 = vld [vmem:[%s326_s3 + $0x60] sm:$0xff]  ;;  %s212_s29 = smov [#allocation2]  }
   0x7   :  { %v34_v6 = vld [vmem:[%s326_s3 + $0x58] sm:$0xff]  ;;  %v33_v7 = vld [vmem:[%s326_s3 + $0x50] sm:$0xff]  ;;  %v32_v8 = vld [vmem:[%s326_s3 + $0x48] sm:$0xff]  ;;  %s153_s30 = sshll.u32 %s212_s29, 4  ;;  %s154_s30 = int_to_ptr.vmem [resolvable:$true] %s153_s30 }
   0x8   :  { %v31_v9 = vld [vmem:[%s326_s3 + $0x40] sm:$0xff]  ;;  %v30_v10 = vld [vmem:[%s326_s3 + $0x38] sm:$0xff]  ;;  %v29_v11 = vld [vmem:[%s326_s3 + $0x30] sm:$0xff] }
   0x9   :  { %v28_v12 = vld [vmem:[%s326_s3 + $0x28] sm:$0xff]  ;;  %v27_v13 = vld [vmem:[%s326_s3 + $0x20] sm:$0xff]  ;;  %v26_v14 = vld [vmem:[%s326_s3 + $0x18] sm:$0xff] }
   0xa   :  { %168 = vmatpush.xpose.msk.msra.mxu1 %vm75_vm1, %v36_v4  ;;  %v25_v15 = vld [vmem:[%s326_s3 + $0x10] sm:$0xff]  ;;  %v24_v16 = vld [vmem:[%s326_s3 + $0x8] sm:$0xff]  ;;  %v23_v17 = vld [vmem:[%s326_s3] sm:$0xff]  ;;  %s155_s3 = sshll.u32 %s328_s5, 4  ;;  %s156_s3 = int_to_ptr.hbm [resolvable:$true] %s155_s3 }
   0xb   :  { %v184_v18 = vld [vmem:[%s325_s2] ss:$0 sm:$0xff] }
   0xc   :  { %v185_v22 = vld [vmem:[%s327_s4] ss:$0 sm:$0xff] }
   0xe   :  { %169 = vmatpush.xpose.msk.msra.mxu1 %vm75_vm1, %v35_v5 }
  0x12   :  { %170 = vmatpush.xpose.msk.msra.mxu1 %vm75_vm1, %v34_v6 }
  0x16   :  { %171 = vmatpush.xpose.msk.msra.mxu1 %vm75_vm1, %v33_v7 }
  0x1a   :  { %172 = vmatpush.xpose.msk.msra.mxu1 %vm75_vm1, %v32_v8 }
  0x1e   :  { %173 = vmatpush.xpose.msk.msra.mxu1 %vm75_vm1, %v31_v9 }
  0x22   :  { %174 = vmatpush.xpose.msk.msra.mxu1 %vm75_vm1, %v30_v10 }
  0x26   :  { %175 = vmatpush.xpose.msk.msra.mxu1 %vm75_vm1, %v29_v11 }
  0x2a   :  { %176 = vmatpush.xpose.msk.msra.mxu1 %vm75_vm1, %v28_v12 }
  0x2e   :  { %177 = vmatpush.xpose.msk.msra.mxu1 %vm75_vm1, %v27_v13 }
  0x32   :  { %178 = vmatpush.xpose.msk.msra.mxu1 %vm75_vm1, %v26_v14 }
  0x36   :  { %179 = vmatpush.xpose.msk.msra.mxu1 %vm75_vm1, %v25_v15 }
  0x3a   :  { %180 = vmatpush.xpose.msk.msra.mxu1 %vm75_vm1, %v24_v16 }
  0x3e   :  { %181 = vmatpush.xpose.msk.msra.mxu1 %vm75_vm1, %v23_v17 }
  0x82   :  { %v67_v19 = vpop.f32.mrf.mxu0 }
  0x83   :  { %v68_v20 = vadd.f32 %v184_v18, %v67_v19 }
  0x85   :  { %v70_v21 = vmax.f32 %v68_v20, 0.0 }
  0x87   :  { %182 = vmatmul.msk.f32.vlgmr.msra.gmra.mxu1 %vm75_vm1, %v70_v21 }
 0x104   :  { %v144_v23 = vpop.f32.mrf.mxu1 }
 0x105   :  { %v145_v24 = vadd.f32 %v185_v22, %v144_v23 }
 0x107   :  { %147 = vst [vmem:[#allocation2] sm:$0xff] %v145_v24 }
 0x108   :  { %158 = dma.vmem_to_hbm [thread:$0]  %s154_s30, 128, %s156_s3, [#allocation3]  }
 0x109   :  { %210 = dma.done.wait [#allocation3], 128  }
 0x10a   :  { %211 = vsyncadd [#allocation3], 4294967168 }
 0x10b   :  { %163 = vsyncpa [#allocation3], 1 }

</bundles_post_ra>
